<compile_context>
chip_gen: v5e
topology: v5e:2x2
jax: 0.10.0
libtpu: 0.0.40
codegen_flags: <defaults>
</compile_context>

<pallas_src>
import functools

import jax
import jax.numpy as jnp
from jax.experimental import pallas as pl
from jax.experimental.pallas import tpu as pltpu


def _round_up(n, m):
    return ((n + m - 1) // m) * m


def _temp_scale_kernel(temp_ref, x_ref, w_ref, b_ref, o_ref, *, matmul_dtype):
    # temp_ref: (1, 1)  f32 SMEM — scalar temperature
    # x_ref:    (TM, Fp) VMEM tile in the input dtype (f32); cast to the matmul
    #           dtype here so the wrapper never makes a separate cast/pad pass.
    # w_ref:    (Fp, Cp) matmul-dtype VMEM, resident across all grid steps
    # b_ref:    (1, Cp)  f32 VMEM, resident
    # o_ref:    (TM, Cp) out-dtype VMEM tile
    inv_t = 1.0 / temp_ref[0, 0]            # one scalar reciprocal per tile
    x = x_ref[...]
    if x.dtype != matmul_dtype:
        x = x.astype(matmul_dtype)           # VPU filler, free under the DMA
    logits = jnp.dot(x, w_ref[...], preferred_element_type=jnp.float32)
    o_ref[...] = ((logits + b_ref[...]) * inv_t).astype(o_ref.dtype)


def model_with_temperature_forward(
    x, w, b, temperature, *,
    tile_m=512,
    matmul_dtype=jnp.bfloat16,   # jnp.float32 = calibration-fidelity escape hatch
    out_dtype=jnp.float32,       # bf16 here halves the logits writeback traffic
):
    """Fused `model(input) / temperature`.

    x: [B, F], w: [F, C], b: [C], temperature: [1]. Returns [B, C] in out_dtype.
    """
    B, F = x.shape
    Fw, C = w.shape
    assert Fw == F

    Fp = _round_up(F, 128)
    Cp = _round_up(C, 128)

    # x stays in HBM in its original dtype; pad only if F is not lane-dense.
    x_in = x if Fp == F else jnp.zeros((B, Fp), x.dtype).at[:, :F].set(x)
    if Fp == F and Cp == C:
        w_in = w.astype(matmul_dtype)
        b_in = b.astype(jnp.float32).reshape(1, C)
    else:
        w_in = jnp.zeros((Fp, Cp), matmul_dtype).at[:F, :C].set(
            w.astype(matmul_dtype))
        b_in = jnp.zeros((1, Cp), jnp.float32).at[0, :C].set(
            b.astype(jnp.float32))
    temp_smem = temperature.reshape(1, 1).astype(jnp.float32)

    # Row tile: multiple of 128; shrink (floor 256) until the grid has >= 4
    # steps so each v7x TensorCore keeps >= 2 pipelined steps.
    tm = _round_up(min(tile_m, _round_up(B, 128)), 128)
    while pl.cdiv(B, tm) < 4 and tm > 256:
        tm = _round_up(tm // 2, 128)

    # No batch padding: the last tile overhangs; OOB x rows are read but their
    # output rows are never stored (masked writeback) and rows are independent.
    grid = (pl.cdiv(B, tm),)

    # Explicit VMEM budget: double-buffered x/out tiles + resident W/bias.
    itemsize = lambda dt: jnp.dtype(dt).itemsize
    vmem_need = (2 * tm * Fp * itemsize(x_in.dtype)
                 + 2 * tm * Cp * itemsize(out_dtype)
                 + Fp * Cp * itemsize(matmul_dtype)
                 + 2 * Cp * 4)
    vmem_limit = min(max(2 * vmem_need, 32 << 20), 64 << 20)

    out = pl.pallas_call(
        functools.partial(_temp_scale_kernel, matmul_dtype=matmul_dtype),
        out_shape=jax.ShapeDtypeStruct((B, Cp), out_dtype),
        grid_spec=pltpu.PrefetchScalarGridSpec(
            num_scalar_prefetch=0,
            grid=grid,
            in_specs=[
                pl.BlockSpec(memory_space=pltpu.SMEM),      # temperature scalar
                pl.BlockSpec((tm, Fp), lambda i: (i, 0)),   # x tile (pipelined)
                pl.BlockSpec((Fp, Cp), lambda i: (0, 0)),   # W (VMEM-resident)
                pl.BlockSpec((1, Cp), lambda i: (0, 0)),    # bias (resident)
            ],
            out_specs=pl.BlockSpec((tm, Cp), lambda i: (i, 0)),
        ),
        compiler_params=pltpu.CompilerParams(
            dimension_semantics=("parallel",),   # batch tiles split across TCs (v7x)
            vmem_limit_bytes=vmem_limit,
        ),
    )(temp_smem, x_in, w_in, b_in)

    return out if Cp == C else out[:, :C]


if __name__ == "__main__":
    key = jax.random.PRNGKey(0)
    k_x, k_w, k_b, k_x2, k_w2, k_b2 = jax.random.split(key, 6)

    # nn.Parameter(torch.ones(1) * 1.5)
    temperature = jnp.ones((1,), dtype=jnp.float32) * 1.5

    # Case 1: lane-aligned F/C (no padding copies), ragged batch ->
    # grid = 3 steps of 256 rows with a masked 88-row overhang on the last tile.
    B, F, C = 600, 256, 128
    x = jax.random.normal(k_x, (B, F), dtype=jnp.float32)
    w = jax.random.normal(k_w, (F, C), dtype=jnp.float32) * 0.02
    b = jax.random.normal(k_b, (C,), dtype=jnp.float32) * 0.1

    out = jax.block_until_ready(
        model_with_temperature_forward(x, w, b, temperature))
    assert out.shape == (B, C)

    # Reference with the same bf16 matmul operands / f32 accumulation.
    ref_bf16 = (x.astype(jnp.bfloat16).astype(jnp.float32)
                @ w.astype(jnp.bfloat16).astype(jnp.float32) + b) / temperature[0]
    assert jnp.allclose(out, ref_bf16, atol=1e-4, rtol=1e-4), "mismatch vs bf16 ref"

    # Sanity vs full-f32 (loose tolerance for bf16 operand rounding).
    ref_f32 = (x @ w + b) / temperature[0]
    assert jnp.allclose(out, ref_f32, atol=5e-2, rtol=5e-2), "mismatch vs f32 ref"

    # f32 escape hatch (calibration-fidelity path).
    out_f32 = jax.block_until_ready(
        model_with_temperature_forward(x, w, b, temperature,
                                       matmul_dtype=jnp.float32))
    assert jnp.allclose(out_f32, ref_f32, atol=1e-2, rtol=1e-2), "f32 path mismatch"

    # Case 2: small, lane-unaligned head — exercises the padding path + overhang.
    B2, F2, C2 = 40, 32, 10
    x2 = jax.random.normal(k_x2, (B2, F2), dtype=jnp.float32)
    w2 = jax.random.normal(k_w2, (F2, C2), dtype=jnp.float32) * 0.1
    b2 = jax.random.normal(k_b2, (C2,), dtype=jnp.float32) * 0.1
    out2 = jax.block_until_ready(
        model_with_temperature_forward(x2, w2, b2, temperature,
                                       matmul_dtype=jnp.float32))
    ref2 = (x2 @ w2 + b2) / temperature[0]
    assert out2.shape == (B2, C2)
    assert jnp.allclose(out2, ref2, atol=1e-2, rtol=1e-2), "padded path mismatch"

    print("KERNEL_OK")
</pallas_src>

<mosaic_0001>
module attributes {stable_mosaic.version = 11 : i64} {
  func.func @_temp_scale_kernel(%arg0: i32, %arg1: memref<1x1xf32, #tpu.memory_space<smem>>, %arg2: memref<256x256xf32, #tpu.memory_space<vmem>>, %arg3: memref<256x128xbf16, #tpu.memory_space<vmem>>, %arg4: memref<1x128xf32, #tpu.memory_space<vmem>>, %arg5: memref<256x128xf32, #tpu.memory_space<vmem>>) attributes {dimension_semantics = [#tpu.dimension_semantics<parallel>], iteration_bounds = array<i64: 3>, scalar_prefetch = 0 : i64, scratch_operands = 0 : i64, tpu.core_type = #tpu.core_type<tc>, window_params = [{transform_indices = @transform_0, window_bounds = array<i64: 1, 1>}, {transform_indices = @transform_1, window_bounds = array<i64: 256, 256>}, {pipeline_mode = #tpu.pipeline_mode<synchronous>, transform_indices = @transform_2, window_bounds = array<i64: 256, 128>}, {pipeline_mode = #tpu.pipeline_mode<synchronous>, transform_indices = @transform_3, window_bounds = array<i64: 1, 128>}, {transform_indices = @transform_4, window_bounds = array<i64: 256, 128>}]} {
    %c0 = arith.constant 0 : index
    %c0_0 = arith.constant 0 : index
    %0 = memref.load %arg1[%c0, %c0_0] : memref<1x1xf32, #tpu.memory_space<smem>>
    %cst = arith.constant 1.000000e+00 : f32
    %1 = arith.divf %cst, %0 : f32
    %c0_1 = arith.constant 0 : index
    %c0_2 = arith.constant 0 : index
    %2 = vector.load %arg2[%c0_1, %c0_2] : memref<256x256xf32, #tpu.memory_space<vmem>>, vector<256x256xf32>
    %3 = arith.truncf %2 : vector<256x256xf32> to vector<256x256xbf16>
    %c0_3 = arith.constant 0 : index
    %c0_4 = arith.constant 0 : index
    %4 = vector.load %arg3[%c0_3, %c0_4] : memref<256x128xbf16, #tpu.memory_space<vmem>>, vector<256x128xbf16>
    %cst_5 = arith.constant dense<0.000000e+00> : vector<256x128xf32>
    %5 = tpu.matmul %3, %4, %cst_5 {dimension_numbers = #tpu.dot_dimension_numbers<[1], [0], [0], [1], [0, 0, 1, 1], [], []>} : vector<256x256xbf16>, vector<256x128xbf16>, vector<256x128xf32> -> vector<256x128xf32>
    %c0_6 = arith.constant 0 : index
    %c0_7 = arith.constant 0 : index
    %6 = vector.load %arg4[%c0_6, %c0_7] : memref<1x128xf32, #tpu.memory_space<vmem>>, vector<1x128xf32>
    %7 = vector.broadcast %6 : vector<1x128xf32> to vector<256x128xf32>
    %8 = arith.addf %5, %7 : vector<256x128xf32>
    %9 = vector.broadcast %1 : f32 to vector<256x128xf32>
    %10 = arith.mulf %8, %9 : vector<256x128xf32>
    %c0_8 = arith.constant 0 : index
    %c0_9 = arith.constant 0 : index
    %11 = vector.load %arg5[%c0_8, %c0_9] : memref<256x128xf32, #tpu.memory_space<vmem>>, vector<256x128xf32>
    tpu.vector_store %arg5[%c0_8, %c0_9], %10 {strides = array<i32>} : memref<256x128xf32, #tpu.memory_space<vmem>>, vector<256x128xf32>,
    return
  }
  func.func @transform_0(%arg0: i32) -> (i32, i32) {
    %c0_i32 = arith.constant 0 : i32
    %c0_i32_0 = arith.constant 0 : i32
    %c0_i32_1 = arith.constant 0 : i32
    return %c0_i32, %c0_i32_0 : i32, i32
  }
  func.func @transform_1(%arg0: i32) -> (i32, i32) {
    %c0_i32 = arith.constant 0 : i32
    %c0_i32_0 = arith.constant 0 : i32
    return %arg0, %c0_i32 : i32, i32
  }
  func.func @transform_2(%arg0: i32) -> (i32, i32) {
    %c0_i32 = arith.constant 0 : i32
    %c0_i32_0 = arith.constant 0 : i32
    %c0_i32_1 = arith.constant 0 : i32
    return %c0_i32, %c0_i32_0 : i32, i32
  }
  func.func @transform_3(%arg0: i32) -> (i32, i32) {
    %c0_i32 = arith.constant 0 : i32
    %c0_i32_0 = arith.constant 0 : i32
    %c0_i32_1 = arith.constant 0 : i32
    return %c0_i32, %c0_i32_0 : i32, i32
  }
  func.func @transform_4(%arg0: i32) -> (i32, i32) {
    %c0_i32 = arith.constant 0 : i32
    %c0_i32_0 = arith.constant 0 : i32
    return %arg0, %c0_i32 : i32, i32
  }
}

</mosaic_0001>

<bundles_post_ra>
// kernel: tpu_custom_call.1
= control target key start
LH: loop header
LB: loop body
LE: loop exit
PB: predicated region body
PF: predicated region fallthrough
CT: control target
= control target key end

     0   :  { %s1594_s0 = inlined_call_operand.<no memory space> [shape: f32[1,1], index: 0, kind: input, shape index: {}]   ;;  %s1595_s1 = inlined_call_operand.hbm [shape: f32[600,256], index: 1, kind: input, shape index: {}]   ;;  %s1596_s2 = inlined_call_operand.hbm [shape: bf16[256,128], index: 2, kind: input, shape index: {}]   ;;  %s1597_s3 = inlined_call_operand.vmem [shape: f32[1,128], index: 3, kind: input, shape index: {}]   ;;  %s1598_s4 = inlined_call_operand.hbm [shape: f32[600,128], index: 4, kind: output, shape index: {}]  }
   0x1   :  { %9 = sst [smem:[#allocation2]] %s1594_s0 }
   0x2   :  { %10 = vsyncpa [#allocation4], 0 }
   0x3   :  { %12 = vsyncpa [#allocation4 + $0x1], 0 }
   0x4   :  { %13 = vsyncpa [#allocation7], 0 }
   0x5   :  { %14 = vsyncpa [#allocation5], 0 }
   0x6   :  { %16 = vsyncpa [#allocation5 + $0x1], 0  ;;  %s1226_s17 = smov 0   ;;  %s1228_s18 = smov 0  }
   0x7   :  { %s1230_s19 = smov 0   ;;  %s1232_s20 = smov 0  }
   0x8 LB: > { %s1247_s0 = sadd.s32 4294967295, %s1187_s20   ;;  %s850_s21 = sadd.s32 4294967294, %s1187_s20   ;;  %s1187_s20 = sphi %s1232_s20, %s1613_s20   ;;  %s1183_s19 = sphi %s1230_s19, %s1612_s19   ;;  %s1179_s18 = sphi %s1228_s18, %s1611_s18   ;;  %s1175_s17 = sphi %s1226_s17, %s1610_s17  }
   0x9   : > { %s1251_s22 = sadd.s32 1, %s1187_s20   ;;  %s50_s23 = sadd.s32 1, %s1183_s19 }
   0xa   : > { %s47_s24 = ssub.s32 %s1187_s20, %s1251_s22  ;;  %p57_p0 = scmp.ne.s32.totalorder %s1183_s19, %s1179_s18 }
   0xb   : > { %p48_p1 = scmp.eq.s32.totalorder %s47_s24, 0  ;;  %p58_p2 = scmp.eq.s32.totalorder %s1187_s20, 0 }
   0xc   : > { %p63_p3 = scmp.ne.s32.totalorder %s1179_s18, %s1175_s17  ;;  %p1599_p4 = scmp.eq.s32.totalorder %s1247_s0, 0 }
   0xd   : > { %s1263_s25 = scalar_select %p48_p1, %s1183_s19, %s50_s23  }
   0xe   : > { %p1265_p5 = por %p58_p2, %p57_p0  ;;  %p1271_p6 = por %p1599_p4, %p63_p3 }
   0xf   : > { %p129_p7 = scmp.eq.s32.totalorder %s1247_s0, 2  ;;  %p135_p8 = scmp.eq.s32.totalorder %s850_s21, 2 }
  0x10   : > { %p851_p9 = scmp.ge.s32.totalorder %s1187_s20, 1  ;;  %p142_p10 = scmp.lt.s32.totalorder %s1187_s20, 4 }
  0x11   : > { %p1278_p11 = por %p129_p7, %p57_p0  ;;  %p1282_p12 = por %p135_p8, %p63_p3 }
  0x12   : > { %p1286_p13 = pnand %p851_p9, %p142_p10  ;;  %s156_s7 = sshll.u32 %s1596_s2, 4  ;;  %s157_s7 = int_to_ptr.hbm [resolvable:$true] %s156_s7 }
  0x13   : > { %s1603_s29 = scalar_select %p1282_p12, 1, 0 }
  0x14   : > { %p984_p1 = pneg %p1286_p13  ;;  %s1189_s8 = smov [#allocation6]  }
  0x15   : > { %s158_s9 = sshll.u32 %s1189_s8, 4  ;;  %s1190_s10 = smov 64   ;;  %s159_s9 = int_to_ptr.vmem [resolvable:$true] %s158_s9 }
  0x16   : > { %p985_p0 = pnand %p984_p1, %p1599_p4  ;;  %s1191_s11 = smov 4  }
  0x17   : > { %p853_p2 = scmp.ge.s32.totalorder %s1187_s20, 3 }
  0x18   : > { %987 = dma.hbm_to_vmem [thread:$0]  (!%p985_p0), %s157_s7, 2048, %s159_s9, [#allocation7], %s1190_s10, %s1190_s10, %s1191_s11  }
  0x19   : > { %171 = sbr.rel (%p853_p2) target bundleno = 66 (0x42), region = 28 }
  0x1e   : > { %174 = sbr.rel (!%p1265_p5) target bundleno = 66 (0x42), region = 32  ;;  %s175_s12 = sand.u32 (%p1265_p5), 1, %s1183_s19  }
  0x1f   : > { %s855_s13 = sshll.u32 (%p1265_p5), %s1187_s20, 5  ;;  %s854_s14 = sshll.u32 (%p1265_p5), %s175_s12, 9 }
  0x20   : > { %s181_s15 = ssub.s32 (%p1265_p5), 75, %s855_s13  ;;  %s1305_s24 = scalar_lea.sflag (%p1265_p5), [#allocation4], %s175_s12 }
  0x21   : > { %p182_p3 = scmp.lt.s32.totalorder (%p1265_p5), %s181_s15, 32  ;;  %s179_s5 = scalar_lea.vmem (%p1265_p5), [#allocation3], %s854_s14 }
  0x23   : > { %s1615_s15 = smov (!%p182_p3, %s181_s15), 32 }
  0x24   : > { %s940_s16 = sshll.u32 %s1615_s15, 4 }
  0x25   : > { %s186_s21 = ssub.s32 512, %s940_s16 }
  0x26   : > { %s187_s23 = sshll.u32 %s186_s21, 4 }
  0x27   : > { %188 = vsyncadd %s1305_s24, %s187_s23  ;;  %p1308_p5 = scmp.ne.s32.totalorder %s940_s16, 0  ;;  %s942_s6 = sshll.u32 %s1187_s20, 9 }
  0x28   : > { %s192_s9 = scalar_lea.hbm %s1595_s1, %s942_s6  ;;  %s1316_s10 = sshll.u32 %s179_s5, 4  ;;  %s197_s10 = int_to_ptr.vmem [resolvable:$true] %s1316_s10 }
  0x29   : > { %s194_s11 = sshll.u32 %s192_s9, 4  ;;  %s862_s12 = sshll.u32 %s1615_s15, 8  ;;  %s1319_s11 = int_to_ptr.hbm [resolvable:$true] %s194_s11 }
  0x2a   : > { %s1067_s13 = sshra.s32 %s1319_s11, 4  ;;  %s1069_s14 = sshrl.u32 %s862_s12, 4  ;;  %s1068_s13 = int_to_ptr.hbm [resolvable:$true] %s1067_s13 }
  0x2b   : > { %s1074_s16 = scalar_lea.hbm %s1068_s13, %s1069_s14  ;;  %s1078_s5 = scalar_lea.hbm %s1595_s1, 1200 }
  0x2c   : > { %p1075_p7 = scmp.ne.s32.totalorder %s1068_s13, %s1074_s16  ;;  %p1079_p10 = scmp.lt.s32.totalorder %s1068_s13, %s1595_s1 }
  0x2d   : > { %p1080_p1 = scmp.lt.s32.totalorder %s1078_s5, %s1074_s16 }
  0x2e   : > { %p1076_p8 = pnand %p1075_p7, %p1308_p5 }
  0x2f   : > { %p1081_p0 = por %p1080_p1, %p1079_p10 }
  0x30   : > { %p1077_p9 = pneg %p1076_p8 }
  0x32   : > { %p1082_p2 = pnand %p1081_p0, %p1077_p9 }
  0x34   : > { %1085 = shalt.err (!%p1082_p2)
}
  0x35   : > { %s1086_s8 = sshra.s32 %s197_s10, 4  ;;  %s1192_s21 = smov [#allocation3]   ;;  %s1087_s8 = int_to_ptr.vmem [resolvable:$true] %s1086_s8 }
  0x36   : > { %s1093_s9 = scalar_lea.vmem %s1087_s8, %s1069_s14  ;;  %s1097_s23 = scalar_lea.vmem %s1192_s21, 1024 }
  0x37   : > { %p1094_p3 = scmp.ne.s32.totalorder %s1087_s8, %s1093_s9  ;;  %p1099_p4 = scmp.lt.s32.totalorder %s1097_s23, %s1093_s9 }
  0x39   : > { %p1095_p7 = pnand %p1094_p3, %p1308_p5 }
  0x3b   : > { %p1096_p8 = pneg %p1095_p7 }
  0x3d   : > { %p1101_p12 = pnand %p1099_p4, %p1096_p8 }
  0x3f   : > { %1104 = shalt.err (!%p1101_p12)
}
  0x40   : > { %s1193_s13 = smov 256   ;;  %s1194_s16 = smov 16  }
  0x41   : > { %202 = dma.hbm_to_vmem [thread:$0]  (%p1308_p5), %s1319_s11, %s862_s12, %s197_s10, %s1305_s24, %s1193_s13, %s1193_s13, %s1194_s16  }
  0x42 PF: > { %208 = sbr.rel (%p1286_p13) target bundleno = 397 (0x18d), region = 36  ;;  %s1348_s14 = sand.u32 (!%p1286_p13), 1, %s1179_s18  }
  0x43   : > { %s864_s5 = sshll.u32 (!%p1286_p13), %s1348_s14, 9  ;;  %s211_s6 = scalar_lea.sflag (!%p1286_p13), [#allocation4], %s1348_s14 }
  0x44   : > { %s1352_s7 = scalar_lea.vmem (!%p1286_p13), [#allocation3], %s864_s5 }
  0x47   : > { %1162 = dma.done.wait (%p1271_p6), %s211_s6, 8192  }
  0x48   : > { %1164 = vsyncadd (%p1271_p6), %s211_s6, 4294959104  ;;  %p1606_p4 = scmp.eq.s32.totalorder %s1247_s0, 0 }
  0x4a   : > { %1166 = dma.done.wait (%p1606_p4), [#allocation7], 2048   ;;  %p1607_p12 = pmov %p1606_p4 }
  0x4b   : > { %v950_v0 = vld [vmem:[#allocation6 + $0x38] sm:$0xff]  ;;  %v949_v2 = vld [vmem:[#allocation6 + $0x30] sm:$0xff]  ;;  %v948_v4 = vld [vmem:[#allocation6 + $0x28] sm:$0xff]  ;;  %s256_s27 = sld [smem:[#allocation2]]  ;;  %s866_s26 = sshll.u32 %s1348_s14, 8 }
  0x4c   : > { %1168 = vsyncadd (%p1607_p12), [#allocation7], 4294965248  ;;  %v958_v1 = vld [vmem:[#allocation6 + $0x78] sm:$0xff]  ;;  %501 = vmatpush.bf16.msra.mxu0 %v950_v0  ;;  %960 = vmatpush.bf16.msra.mxu2 %v950_v0  ;;  %v957_v3 = vld [vmem:[#allocation6 + $0x70] sm:$0xff]  ;;  %s1437_s10 = scalar_lea.vmem [#allocation8], %s866_s26  ;;  %s745_s11 = scalar_lea.sflag [#allocation5], %s1348_s14 }
  0x4d   : > { %590 = vmatpush.bf16.msra.mxu1 %v958_v1  ;;  %968 = vmatpush.bf16.msra.mxu3 %v958_v1  ;;  %v956_v5 = vld [vmem:[#allocation6 + $0x68] sm:$0xff]  ;;  %v947_v6 = vld [vmem:[#allocation6 + $0x20] sm:$0xff]  ;;  %v946_v8 = vld [vmem:[#allocation6 + $0x18] sm:$0xff]  ;;  %s932_s12 = sshll.u32 (%p1278_p11), %s1247_s0, 5 }
  0x4e   : > { %v955_v7 = vld [vmem:[#allocation6 + $0x60] sm:$0xff]  ;;  %v954_v9 = vld [vmem:[#allocation6 + $0x58] sm:$0xff]  ;;  %v945_v10 = vld [vmem:[#allocation6 + $0x10] sm:$0xff]  ;;  %s753_s8 = ssub.s32 (%p1278_p11), 75, %s932_s12 }
  0x4f   : > { %v953_v11 = vld [vmem:[#allocation6 + $0x50] sm:$0xff]  ;;  %v944_v12 = vld [vmem:[#allocation6 + $0x8] sm:$0xff]  ;;  %v943_v14 = vld [vmem:[#allocation6] sm:$0xff]  ;;  %p754_p6 = scmp.lt.s32.totalorder (%p1278_p11), %s753_s8, 32 }
  0x50   : > { %502 = vmatpush.bf16.msra.mxu0 %v949_v2  ;;  %961 = vmatpush.bf16.msra.mxu2 %v949_v2  ;;  %v952_v13 = vld [vmem:[#allocation6 + $0x48] sm:$0xff]  ;;  %v951_v15 = vld [vmem:[#allocation6 + $0x40] sm:$0xff]  ;;  %v275_v17 = vld [vmem:[%s1352_s7 + $0x10] sm:$0xff] }
  0x51   : > { %591 = vmatpush.bf16.msra.mxu1 %v957_v3  ;;  %969 = vmatpush.bf16.msra.mxu3 %v957_v3  ;;  %v273_v16 = vld [vmem:[%s1352_s7] sm:$0xff]  ;;  %v307_v19 = vld [vmem:[%s1352_s7 + $0x110] sm:$0xff]  ;;  %v274_v20 = vld [vmem:[%s1352_s7 + $0x8] sm:$0xff]  ;;  %v257_v52 = vstv %s256_s27 }
  0x52   : > { %v305_v18 = vld [vmem:[%s1352_s7 + $0x100] sm:$0xff]  ;;  %v276_v21 = vld [vmem:[%s1352_s7 + $0x18] sm:$0xff]  ;;  %v306_v22 = vld [vmem:[%s1352_s7 + $0x108] sm:$0xff]  ;;  %v337_v24 = vpack.c.bf16 %v275_v17, %v273_v16  ;;  %1035 = vrcp.f32 %v257_v52  ;;  %vm263_vm0 = vweird.f32 %v257_v52 }
  0x53   : > { %v308_v23 = vld [vmem:[%s1352_s7 + $0x118] sm:$0xff]  ;;  %v353_v25 = vpack.c.bf16 %v307_v19, %v305_v18  ;;  %v338_v26 = vpack.c.bf16 %v276_v21, %v274_v20  ;;  %v277_v28 = vld [vmem:[%s1352_s7 + $0x20] sm:$0xff]  ;;  %v279_v29 = vld [vmem:[%s1352_s7 + $0x30] sm:$0xff] }
  0x54   : > { %503 = vmatpush.bf16.msra.mxu0 %v948_v4  ;;  %962 = vmatpush.bf16.msra.mxu2 %v948_v4  ;;  %v354_v27 = vpack.c.bf16 %v308_v23, %v306_v22  ;;  %v309_v30 = vld [vmem:[%s1352_s7 + $0x120] sm:$0xff]  ;;  %v311_v31 = vld [vmem:[%s1352_s7 + $0x130] sm:$0xff]  ;;  %v278_v32 = vld [vmem:[%s1352_s7 + $0x28] sm:$0xff]  ;;  %v339_v36 = vpack.c.bf16 %v279_v29, %v277_v28 }
  0x55   : > { %592 = vmatpush.bf16.msra.mxu1 %v956_v5  ;;  %970 = vmatpush.bf16.msra.mxu3 %v956_v5  ;;  %v280_v33 = vld [vmem:[%s1352_s7 + $0x38] sm:$0xff]  ;;  %v310_v34 = vld [vmem:[%s1352_s7 + $0x128] sm:$0xff]  ;;  %v355_v37 = vpack.c.bf16 %v311_v31, %v309_v30  ;;  %v281_v40 = vld [vmem:[%s1352_s7 + $0x40] sm:$0xff]  ;;  %v267_v5 = vand.u32 2147483647, %v257_v52 }
  0x56   : > { %v312_v35 = vld [vmem:[%s1352_s7 + $0x138] sm:$0xff]  ;;  %v340_v38 = vpack.c.bf16 %v280_v33, %v278_v32  ;;  %v283_v41 = vld [vmem:[%s1352_s7 + $0x50] sm:$0xff]  ;;  %v313_v42 = vld [vmem:[%s1352_s7 + $0x140] sm:$0xff] }
  0x57   : > { %v356_v39 = vpack.c.bf16 %v312_v35, %v310_v34  ;;  %v315_v43 = vld [vmem:[%s1352_s7 + $0x150] sm:$0xff]  ;;  %v282_v44 = vld [vmem:[%s1352_s7 + $0x48] sm:$0xff]  ;;  %v284_v45 = vld [vmem:[%s1352_s7 + $0x58] sm:$0xff]  ;;  %v341_v48 = vpack.c.bf16 %v283_v41, %v281_v40  ;;  %vm268_vm3 = vcmp.eq.f32.partialorder %v267_v5, 8.507059e+37 }
  0x58   : > { %504 = vmatpush.bf16.msra.mxu0 %v947_v6  ;;  %963 = vmatpush.bf16.msra.mxu2 %v947_v6  ;;  %v314_v46 = vld [vmem:[%s1352_s7 + $0x148] sm:$0xff]  ;;  %v316_v47 = vld [vmem:[%s1352_s7 + $0x158] sm:$0xff]  ;;  %v357_v49 = vpack.c.bf16 %v315_v43, %v313_v42  ;;  %v342_v50 = vpack.c.bf16 %v284_v45, %v282_v44  ;;  %v285_v53 = vld [vmem:[%s1352_s7 + $0x60] sm:$0xff]  ;;  %v1036_v61 = vpop.eup %1035  ;;  %v269_v6 = vand.u32 2147483648, %v257_v52 }
  0x59   : > { %593 = vmatpush.bf16.msra.mxu1 %v955_v7  ;;  %971 = vmatpush.bf16.msra.mxu3 %v955_v7  ;;  %v358_v51 = vpack.c.bf16 %v316_v47, %v314_v46  ;;  %v287_v54 = vld [vmem:[%s1352_s7 + $0x70] sm:$0xff]  ;;  %v317_v55 = vld [vmem:[%s1352_s7 + $0x160] sm:$0xff]  ;;  %v286_v57 = vld [vmem:[%s1352_s7 + $0x68] sm:$0xff]  ;;  %v259_v0 = vmul.f32 %v1036_v61, %v257_v52  ;;  %vm264_vm1 = vweird.f32 %v1036_v61 }
  0x5a   : > { %v319_v56 = vld [vmem:[%s1352_s7 + $0x170] sm:$0xff]  ;;  %v288_v58 = vld [vmem:[%s1352_s7 + $0x78] sm:$0xff]  ;;  %v318_v59 = vld [vmem:[%s1352_s7 + $0x168] sm:$0xff]  ;;  %v343_v62 = vpack.c.bf16 %v287_v54, %v285_v53 }
  0x5b   : > { %v320_v60 = vld [vmem:[%s1352_s7 + $0x178] sm:$0xff]  ;;  %v359_v63 = vpack.c.bf16 %v319_v56, %v317_v55  ;;  %v344_v1 = vpack.c.bf16 %v288_v58, %v286_v57  ;;  %v260_v3 = vsub.f32 1.0, %v259_v0  ;;  %vm265_vm2 = vmor %vm263_vm0, %vm264_vm1  ;;  %v322_v17 = vld [vmem:[%s1352_s7 + $0x188] sm:$0xff] }
  0x5c   : > { %505 = vmatpush.bf16.msra.mxu0 %v946_v8  ;;  %964 = vmatpush.bf16.msra.mxu2 %v946_v8  ;;  %v360_v2 = vpack.c.bf16 %v320_v60, %v318_v59  ;;  %v270_v8 = vor.u32 1.1754944e-38, %v269_v6  ;;  %v292_v16 = vld [vmem:[%s1352_s7 + $0x98] sm:$0xff]  ;;  %v293_v23 = vld [vmem:[%s1352_s7 + $0xa0] sm:$0xff]  ;;  %v326_v29 = vld [vmem:[%s1352_s7 + $0x1a8] sm:$0xff] }
  0x5d   : > { %594 = vmatpush.bf16.msra.mxu1 %v954_v9  ;;  %972 = vmatpush.bf16.msra.mxu3 %v954_v9  ;;  %v261_v4 = vmul.f32 %v1036_v61, %v260_v3  ;;  %v324_v18 = vld [vmem:[%s1352_s7 + $0x198] sm:$0xff]  ;;  %v297_v35 = vld [vmem:[%s1352_s7 + $0xc0] sm:$0xff]  ;;  %v330_v41 = vld [vmem:[%s1352_s7 + $0x1c8] sm:$0xff] }
  0x5e   : > { %v362_v22 = vpack.c.bf16 %v324_v18, %v322_v17  ;;  %v296_v28 = vld [vmem:[%s1352_s7 + $0xb8] sm:$0xff]  ;;  %v301_v47 = vld [vmem:[%s1352_s7 + $0xe0] sm:$0xff]  ;;  %v334_v53 = vld [vmem:[%s1352_s7 + $0x1e8] sm:$0xff] }
  0x5f   : > { %v262_v7 = vadd.f32 %v1036_v61, %v261_v4  ;;  %v328_v30 = vld [vmem:[%s1352_s7 + $0x1b8] sm:$0xff]  ;;  %v1429_v59 = vld [vmem:[%s1597_s3] ss:$0 sm:$0xff] }
  0x60   : > { %506 = vmatpush.bf16.msra.mxu0 %v945_v10  ;;  %965 = vmatpush.bf16.msra.mxu2 %v945_v10  ;;  %v364_v34 = vpack.c.bf16 %v328_v30, %v326_v29  ;;  %v300_v40 = vld [vmem:[%s1352_s7 + $0xd8] sm:$0xff] }
  0x61   : > { %595 = vmatpush.bf16.msra.mxu1 %v953_v11  ;;  %973 = vmatpush.bf16.msra.mxu3 %v953_v11  ;;  %v266_v9 = vsel %vm265_vm2, %v1036_v61, %v262_v7  ;;  %v289_v11 = vld [vmem:[%s1352_s7 + $0x80] sm:$0xff]  ;;  %v332_v42 = vld [vmem:[%s1352_s7 + $0x1d8] sm:$0xff] }
  0x62   : > { %v271_v10 = vsel %vm268_vm3, %v270_v8, %v266_v9  ;;  %v366_v46 = vpack.c.bf16 %v332_v42, %v330_v41  ;;  %v304_v52 = vld [vmem:[%s1352_s7 + $0xf8] sm:$0xff] }
  0x63   : > { %976 = vpush %v271_v10  ;;  %v336_v54 = vld [vmem:[%s1352_s7 + $0x1f8] sm:$0xff] }
  0x64   : > { %507 = vmatpush.bf16.msra.mxu0 %v944_v12  ;;  %966 = vmatpush.bf16.msra.mxu2 %v944_v12  ;;  %v291_v12 = vld [vmem:[%s1352_s7 + $0x90] sm:$0xff]  ;;  %v368_v58 = vpack.c.bf16 %v336_v54, %v334_v53 }
  0x65   : > { %596 = vmatpush.bf16.msra.mxu1 %v952_v13  ;;  %974 = vmatpush.bf16.msra.mxu3 %v952_v13  ;;  %v321_v13 = vld [vmem:[%s1352_s7 + $0x180] sm:$0xff]  ;;  %v345_v19 = vpack.c.bf16 %v291_v12, %v289_v11 }
  0x68   : > { %508 = vmatpush.bf16.msra.mxu0 %v943_v14  ;;  %967 = vmatpush.bf16.msra.mxu2 %v943_v14  ;;  %v323_v14 = vld [vmem:[%s1352_s7 + $0x190] sm:$0xff] }
  0x69   : > { %597 = vmatpush.bf16.msra.mxu1 %v951_v15  ;;  %975 = vmatpush.bf16.msra.mxu3 %v951_v15  ;;  %v290_v15 = vld [vmem:[%s1352_s7 + $0x88] sm:$0xff]  ;;  %v361_v20 = vpack.c.bf16 %v323_v14, %v321_v13 }
  0x6a   : > { %v346_v21 = vpack.c.bf16 %v292_v16, %v290_v15 }
  0x6b   : > { %509 = vmatmul.bf16.vlgmr.msra.gmra.mxu0 %v337_v24  ;;  %549 = vmatmul.bf16.vlgmr.msra.gmra.mxu2 %v353_v25  ;;  %v295_v24 = vld [vmem:[%s1352_s7 + $0xb0] sm:$0xff]  ;;  %v325_v25 = vld [vmem:[%s1352_s7 + $0x1a0] sm:$0xff] }
  0x6c   : > { %598 = vmatmul.bf16.vlgmr.msra.gmra.mxu1 %v338_v26  ;;  %638 = vmatmul.bf16.vlgmr.msra.gmra.mxu3 %v354_v27  ;;  %v327_v26 = vld [vmem:[%s1352_s7 + $0x1b0] sm:$0xff]  ;;  %v294_v27 = vld [vmem:[%s1352_s7 + $0xa8] sm:$0xff]  ;;  %v347_v31 = vpack.c.bf16 %v295_v24, %v293_v23 }
  0x6d   : > { %v363_v32 = vpack.c.bf16 %v327_v26, %v325_v25  ;;  %v348_v33 = vpack.c.bf16 %v296_v28, %v294_v27 }
  0x7b   : > { %514 = vmatmul.bf16.gmra.mxu0 %v339_v36  ;;  %554 = vmatmul.bf16.gmra.mxu2 %v355_v37  ;;  %v299_v36 = vld [vmem:[%s1352_s7 + $0xd0] sm:$0xff]  ;;  %v329_v37 = vld [vmem:[%s1352_s7 + $0x1c0] sm:$0xff] }
  0x7c   : > { %603 = vmatmul.bf16.gmra.mxu1 %v340_v38  ;;  %643 = vmatmul.bf16.gmra.mxu3 %v356_v39  ;;  %v331_v38 = vld [vmem:[%s1352_s7 + $0x1d0] sm:$0xff]  ;;  %v298_v39 = vld [vmem:[%s1352_s7 + $0xc8] sm:$0xff]  ;;  %v349_v43 = vpack.c.bf16 %v299_v36, %v297_v35 }
  0x7d   : > { %v365_v44 = vpack.c.bf16 %v331_v38, %v329_v37  ;;  %v350_v45 = vpack.c.bf16 %v300_v40, %v298_v39 }
  0x8b   : > { %519 = vmatmul.bf16.gmra.mxu0 %v341_v48  ;;  %559 = vmatmul.bf16.gmra.mxu2 %v357_v49  ;;  %v303_v48 = vld [vmem:[%s1352_s7 + $0xf0] sm:$0xff]  ;;  %v333_v49 = vld [vmem:[%s1352_s7 + $0x1e0] sm:$0xff] }
  0x8c   : > { %608 = vmatmul.bf16.gmra.mxu1 %v342_v50  ;;  %648 = vmatmul.bf16.gmra.mxu3 %v358_v51  ;;  %v335_v50 = vld [vmem:[%s1352_s7 + $0x1f0] sm:$0xff]  ;;  %v302_v51 = vld [vmem:[%s1352_s7 + $0xe8] sm:$0xff]  ;;  %v351_v55 = vpack.c.bf16 %v303_v48, %v301_v47 }
  0x8d   : > { %v367_v56 = vpack.c.bf16 %v335_v50, %v333_v49  ;;  %v352_v57 = vpack.c.bf16 %v304_v52, %v302_v51 }
  0x94   : > { %s977_s24 = spop %976 }
  0x9b   : > { %524 = vmatmul.bf16.gmra.mxu0 %v343_v62  ;;  %564 = vmatmul.bf16.gmra.mxu2 %v359_v63  ;;  %v1433_v63 = vstv %s977_s24 }
  0x9c   : > { %613 = vmatmul.bf16.gmra.mxu1 %v344_v1  ;;  %653 = vmatmul.bf16.gmra.mxu3 %v360_v2 }
  0xab   : > { %529 = vmatmul.bf16.gmra.mxu0 %v345_v19  ;;  %569 = vmatmul.bf16.gmra.mxu2 %v361_v20 }
  0xac   : > { %618 = vmatmul.bf16.gmra.mxu1 %v346_v21  ;;  %658 = vmatmul.bf16.gmra.mxu3 %v362_v22 }
  0xbb   : > { %534 = vmatmul.bf16.gmra.mxu0 %v347_v31  ;;  %574 = vmatmul.bf16.gmra.mxu2 %v363_v32 }
  0xbc   : > { %623 = vmatmul.bf16.gmra.mxu1 %v348_v33  ;;  %663 = vmatmul.bf16.gmra.mxu3 %v364_v34 }
  0xcb   : > { %539 = vmatmul.bf16.gmra.mxu0 %v349_v43  ;;  %579 = vmatmul.bf16.gmra.mxu2 %v365_v44 }
  0xcc   : > { %628 = vmatmul.bf16.gmra.mxu1 %v350_v45  ;;  %668 = vmatmul.bf16.gmra.mxu3 %v366_v46 }
  0xdb   : > { %544 = vmatmul.bf16.gmra.mxu0 %v351_v55  ;;  %584 = vmatmul.bf16.gmra.mxu2 %v367_v56 }
  0xdc   : > { %633 = vmatmul.bf16.gmra.mxu1 %v352_v57  ;;  %673 = vmatmul.bf16.gmra.mxu3 %v368_v58 }
  0xe8   : > { %v510_v60 = vpop.f32.mrf.mxu0 }
  0xe9   : > { %v511_v61 = vadd.f32 %v1429_v59, %v510_v60  ;;  %v599_v62 = vpop.f32.mrf.mxu1 }
  0xeb   : > { %v600_v0 = vadd.f32 %v599_v62, %v511_v61 }
  0xed   : > { %v680_v1 = vmul.f32 %v1433_v63, %v600_v0 }
  0xee   : > { %v550_v2 = vpop.f32.mrf.mxu2 }
  0xef   : > { %v551_v3 = vadd.f32 %v1429_v59, %v550_v2  ;;  %v639_v4 = vpop.f32.mrf.mxu3  ;;  %712 = vst [vmem:[%s1437_s10] sm:$0xff] %v680_v1 }
  0xf0   : > { %v512_v5 = vpop.f32.mrf.mxu0 }
  0xf1   : > { %v640_v6 = vadd.f32 %v639_v4, %v551_v3  ;;  %v513_v7 = vadd.f32 %v1429_v59, %v512_v5  ;;  %v601_v8 = vpop.f32.mrf.mxu1 }
  0xf3   : > { %v602_v9 = vadd.f32 %v601_v8, %v513_v7  ;;  %v696_v10 = vmul.f32 %v1433_v63, %v640_v6 }
  0xf5   : > { %v681_v11 = vmul.f32 %v1433_v63, %v602_v9  ;;  %728 = vst [vmem:[%s1437_s10 + $0x80] sm:$0xff] %v696_v10 }
  0xf6   : > { %v552_v12 = vpop.f32.mrf.mxu2 }
  0xf7   : > { %713 = vst [vmem:[%s1437_s10 + $0x8] sm:$0xff] %v681_v11  ;;  %v553_v13 = vadd.f32 %v1429_v59, %v552_v12  ;;  %v641_v14 = vpop.f32.mrf.mxu3 }
  0xf8   : > { %v515_v15 = vpop.f32.mrf.mxu0 }
  0xf9   : > { %v642_v16 = vadd.f32 %v641_v14, %v553_v13  ;;  %v516_v17 = vadd.f32 %v1429_v59, %v515_v15  ;;  %v604_v18 = vpop.f32.mrf.mxu1 }
  0xfb   : > { %v697_v19 = vmul.f32 %v1433_v63, %v642_v16  ;;  %v605_v20 = vadd.f32 %v604_v18, %v516_v17 }
  0xfd   : > { %729 = vst [vmem:[%s1437_s10 + $0x88] sm:$0xff] %v697_v19  ;;  %v682_v21 = vmul.f32 %v1433_v63, %v605_v20 }
  0xfe   : > { %v555_v22 = vpop.f32.mrf.mxu2 }
  0xff   : > { %714 = vst [vmem:[%s1437_s10 + $0x10] sm:$0xff] %v682_v21  ;;  %v556_v23 = vadd.f32 %v1429_v59, %v555_v22  ;;  %v644_v24 = vpop.f32.mrf.mxu3 }
 0x100   : > { %v517_v25 = vpop.f32.mrf.mxu0 }
 0x101   : > { %v645_v26 = vadd.f32 %v644_v24, %v556_v23  ;;  %v518_v27 = vadd.f32 %v1429_v59, %v517_v25  ;;  %v606_v28 = vpop.f32.mrf.mxu1 }
 0x103   : > { %v698_v29 = vmul.f32 %v1433_v63, %v645_v26  ;;  %v607_v30 = vadd.f32 %v606_v28, %v518_v27 }
 0x105   : > { %730 = vst [vmem:[%s1437_s10 + $0x90] sm:$0xff] %v698_v29  ;;  %v683_v31 = vmul.f32 %v1433_v63, %v607_v30 }
 0x106   : > { %v557_v32 = vpop.f32.mrf.mxu2 }
 0x107   : > { %715 = vst [vmem:[%s1437_s10 + $0x18] sm:$0xff] %v683_v31  ;;  %v558_v33 = vadd.f32 %v1429_v59, %v557_v32  ;;  %v646_v34 = vpop.f32.mrf.mxu3 }
 0x108   : > { %v520_v35 = vpop.f32.mrf.mxu0 }
 0x109   : > { %v647_v36 = vadd.f32 %v646_v34, %v558_v33  ;;  %v521_v37 = vadd.f32 %v1429_v59, %v520_v35  ;;  %v609_v38 = vpop.f32.mrf.mxu1 }
 0x10b   : > { %v699_v39 = vmul.f32 %v1433_v63, %v647_v36  ;;  %v610_v40 = vadd.f32 %v609_v38, %v521_v37 }
 0x10d   : > { %731 = vst [vmem:[%s1437_s10 + $0x98] sm:$0xff] %v699_v39  ;;  %v684_v41 = vmul.f32 %v1433_v63, %v610_v40 }
 0x10e   : > { %v560_v42 = vpop.f32.mrf.mxu2 }
 0x10f   : > { %716 = vst [vmem:[%s1437_s10 + $0x20] sm:$0xff] %v684_v41  ;;  %v561_v43 = vadd.f32 %v1429_v59, %v560_v42  ;;  %v649_v44 = vpop.f32.mrf.mxu3 }
 0x110   : > { %v522_v45 = vpop.f32.mrf.mxu0 }
 0x111   : > { %v650_v46 = vadd.f32 %v649_v44, %v561_v43  ;;  %v523_v47 = vadd.f32 %v1429_v59, %v522_v45  ;;  %v611_v48 = vpop.f32.mrf.mxu1 }
 0x113   : > { %v700_v49 = vmul.f32 %v1433_v63, %v650_v46  ;;  %v612_v50 = vadd.f32 %v611_v48, %v523_v47 }
 0x115   : > { %732 = vst [vmem:[%s1437_s10 + $0xa0] sm:$0xff] %v700_v49  ;;  %v685_v51 = vmul.f32 %v1433_v63, %v612_v50 }
 0x116   : > { %v562_v52 = vpop.f32.mrf.mxu2 }
 0x117   : > { %717 = vst [vmem:[%s1437_s10 + $0x28] sm:$0xff] %v685_v51  ;;  %v563_v53 = vadd.f32 %v1429_v59, %v562_v52  ;;  %v651_v54 = vpop.f32.mrf.mxu3 }
 0x118   : > { %v525_v55 = vpop.f32.mrf.mxu0 }
 0x119   : > { %v652_v56 = vadd.f32 %v651_v54, %v563_v53  ;;  %v526_v57 = vadd.f32 %v1429_v59, %v525_v55  ;;  %v614_v58 = vpop.f32.mrf.mxu1 }
 0x11b   : > { %v701_v60 = vmul.f32 %v1433_v63, %v652_v56  ;;  %v615_v61 = vadd.f32 %v614_v58, %v526_v57 }
 0x11d   : > { %733 = vst [vmem:[%s1437_s10 + $0xa8] sm:$0xff] %v701_v60  ;;  %v686_v62 = vmul.f32 %v1433_v63, %v615_v61 }
 0x11e   : > { %v565_v0 = vpop.f32.mrf.mxu2 }
 0x11f   : > { %718 = vst [vmem:[%s1437_s10 + $0x30] sm:$0xff] %v686_v62  ;;  %v566_v1 = vadd.f32 %v1429_v59, %v565_v0  ;;  %v654_v2 = vpop.f32.mrf.mxu3 }
 0x120   : > { %v527_v3 = vpop.f32.mrf.mxu0 }
 0x121   : > { %v655_v4 = vadd.f32 %v654_v2, %v566_v1  ;;  %v528_v5 = vadd.f32 %v1429_v59, %v527_v3  ;;  %v616_v6 = vpop.f32.mrf.mxu1 }
 0x123   : > { %v702_v7 = vmul.f32 %v1433_v63, %v655_v4  ;;  %v617_v8 = vadd.f32 %v616_v6, %v528_v5 }
 0x125   : > { %734 = vst [vmem:[%s1437_s10 + $0xb0] sm:$0xff] %v702_v7  ;;  %v687_v9 = vmul.f32 %v1433_v63, %v617_v8 }
 0x126   : > { %v567_v10 = vpop.f32.mrf.mxu2 }
 0x127   : > { %719 = vst [vmem:[%s1437_s10 + $0x38] sm:$0xff] %v687_v9  ;;  %v568_v11 = vadd.f32 %v1429_v59, %v567_v10  ;;  %v656_v12 = vpop.f32.mrf.mxu3 }
 0x128   : > { %v530_v13 = vpop.f32.mrf.mxu0 }
 0x129   : > { %v657_v14 = vadd.f32 %v656_v12, %v568_v11  ;;  %v531_v15 = vadd.f32 %v1429_v59, %v530_v13  ;;  %v619_v16 = vpop.f32.mrf.mxu1 }
 0x12b   : > { %v703_v17 = vmul.f32 %v1433_v63, %v657_v14  ;;  %v620_v18 = vadd.f32 %v619_v16, %v531_v15 }
 0x12d   : > { %735 = vst [vmem:[%s1437_s10 + $0xb8] sm:$0xff] %v703_v17  ;;  %v688_v19 = vmul.f32 %v1433_v63, %v620_v18 }
 0x12e   : > { %v570_v20 = vpop.f32.mrf.mxu2 }
 0x12f   : > { %720 = vst [vmem:[%s1437_s10 + $0x40] sm:$0xff] %v688_v19  ;;  %v571_v21 = vadd.f32 %v1429_v59, %v570_v20  ;;  %v659_v22 = vpop.f32.mrf.mxu3 }
 0x130   : > { %v532_v23 = vpop.f32.mrf.mxu0 }
 0x131   : > { %v660_v24 = vadd.f32 %v659_v22, %v571_v21  ;;  %v533_v25 = vadd.f32 %v1429_v59, %v532_v23  ;;  %v621_v26 = vpop.f32.mrf.mxu1 }
 0x133   : > { %v704_v27 = vmul.f32 %v1433_v63, %v660_v24  ;;  %v622_v28 = vadd.f32 %v621_v26, %v533_v25 }
 0x135   : > { %736 = vst [vmem:[%s1437_s10 + $0xc0] sm:$0xff] %v704_v27  ;;  %v689_v29 = vmul.f32 %v1433_v63, %v622_v28 }
 0x136   : > { %v572_v30 = vpop.f32.mrf.mxu2 }
 0x137   : > { %721 = vst [vmem:[%s1437_s10 + $0x48] sm:$0xff] %v689_v29  ;;  %v573_v31 = vadd.f32 %v1429_v59, %v572_v30  ;;  %v661_v32 = vpop.f32.mrf.mxu3 }
 0x138   : > { %v535_v33 = vpop.f32.mrf.mxu0 }
 0x139   : > { %v662_v34 = vadd.f32 %v661_v32, %v573_v31  ;;  %v536_v35 = vadd.f32 %v1429_v59, %v535_v33  ;;  %v624_v36 = vpop.f32.mrf.mxu1 }
 0x13b   : > { %v705_v37 = vmul.f32 %v1433_v63, %v662_v34  ;;  %v625_v38 = vadd.f32 %v624_v36, %v536_v35 }
 0x13d   : > { %737 = vst [vmem:[%s1437_s10 + $0xc8] sm:$0xff] %v705_v37  ;;  %v690_v39 = vmul.f32 %v1433_v63, %v625_v38 }
 0x13e   : > { %v575_v40 = vpop.f32.mrf.mxu2 }
 0x13f   : > { %722 = vst [vmem:[%s1437_s10 + $0x50] sm:$0xff] %v690_v39  ;;  %v576_v41 = vadd.f32 %v1429_v59, %v575_v40  ;;  %v664_v42 = vpop.f32.mrf.mxu3 }
 0x140   : > { %v537_v43 = vpop.f32.mrf.mxu0 }
 0x141   : > { %v665_v44 = vadd.f32 %v664_v42, %v576_v41  ;;  %v538_v45 = vadd.f32 %v1429_v59, %v537_v43  ;;  %v626_v46 = vpop.f32.mrf.mxu1 }
 0x143   : > { %v706_v47 = vmul.f32 %v1433_v63, %v665_v44  ;;  %v627_v48 = vadd.f32 %v626_v46, %v538_v45 }
 0x145   : > { %738 = vst [vmem:[%s1437_s10 + $0xd0] sm:$0xff] %v706_v47  ;;  %v691_v49 = vmul.f32 %v1433_v63, %v627_v48 }
 0x146   : > { %v577_v50 = vpop.f32.mrf.mxu2 }
 0x147   : > { %723 = vst [vmem:[%s1437_s10 + $0x58] sm:$0xff] %v691_v49  ;;  %v578_v51 = vadd.f32 %v1429_v59, %v577_v50  ;;  %v666_v52 = vpop.f32.mrf.mxu3 }
 0x148   : > { %v540_v53 = vpop.f32.mrf.mxu0 }
 0x149   : > { %v667_v54 = vadd.f32 %v666_v52, %v578_v51  ;;  %v541_v55 = vadd.f32 %v1429_v59, %v540_v53  ;;  %v629_v56 = vpop.f32.mrf.mxu1 }
 0x14b   : > { %v707_v57 = vmul.f32 %v1433_v63, %v667_v54  ;;  %v630_v58 = vadd.f32 %v629_v56, %v541_v55 }
 0x14d   : > { %739 = vst [vmem:[%s1437_s10 + $0xd8] sm:$0xff] %v707_v57  ;;  %v692_v60 = vmul.f32 %v1433_v63, %v630_v58 }
 0x14e   : > { %v580_v61 = vpop.f32.mrf.mxu2 }
 0x14f   : > { %724 = vst [vmem:[%s1437_s10 + $0x60] sm:$0xff] %v692_v60  ;;  %v581_v62 = vadd.f32 %v1429_v59, %v580_v61  ;;  %v669_v0 = vpop.f32.mrf.mxu3 }
 0x150   : > { %v542_v1 = vpop.f32.mrf.mxu0 }
 0x151   : > { %v670_v2 = vadd.f32 %v669_v0, %v581_v62  ;;  %v543_v3 = vadd.f32 %v1429_v59, %v542_v1  ;;  %v631_v4 = vpop.f32.mrf.mxu1 }
 0x153   : > { %v708_v5 = vmul.f32 %v1433_v63, %v670_v2  ;;  %v632_v6 = vadd.f32 %v631_v4, %v543_v3 }
 0x155   : > { %740 = vst [vmem:[%s1437_s10 + $0xe0] sm:$0xff] %v708_v5  ;;  %v693_v7 = vmul.f32 %v1433_v63, %v632_v6 }
 0x156   : > { %v582_v8 = vpop.f32.mrf.mxu2 }
 0x157   : > { %725 = vst [vmem:[%s1437_s10 + $0x68] sm:$0xff] %v693_v7  ;;  %v583_v9 = vadd.f32 %v1429_v59, %v582_v8  ;;  %v671_v10 = vpop.f32.mrf.mxu3 }
 0x158   : > { %v545_v11 = vpop.f32.mrf.mxu0 }
 0x159   : > { %v672_v12 = vadd.f32 %v671_v10, %v583_v9  ;;  %v546_v13 = vadd.f32 %v1429_v59, %v545_v11  ;;  %v634_v14 = vpop.f32.mrf.mxu1 }
 0x15b   : > { %v709_v15 = vmul.f32 %v1433_v63, %v672_v12  ;;  %v635_v16 = vadd.f32 %v634_v14, %v546_v13 }
 0x15d   : > { %741 = vst [vmem:[%s1437_s10 + $0xe8] sm:$0xff] %v709_v15  ;;  %v694_v17 = vmul.f32 %v1433_v63, %v635_v16 }
 0x15e   : > { %v585_v18 = vpop.f32.mrf.mxu2 }
 0x15f   : > { %726 = vst [vmem:[%s1437_s10 + $0x70] sm:$0xff] %v694_v17  ;;  %v586_v19 = vadd.f32 %v1429_v59, %v585_v18  ;;  %v674_v20 = vpop.f32.mrf.mxu3 }
 0x160   : > { %v547_v21 = vpop.f32.mrf.mxu0 }
 0x161   : > { %v675_v22 = vadd.f32 %v674_v20, %v586_v19  ;;  %v548_v23 = vadd.f32 %v1429_v59, %v547_v21  ;;  %v636_v24 = vpop.f32.mrf.mxu1 }
 0x163   : > { %v710_v25 = vmul.f32 %v1433_v63, %v675_v22  ;;  %v637_v26 = vadd.f32 %v636_v24, %v548_v23 }
 0x165   : > { %742 = vst [vmem:[%s1437_s10 + $0xf0] sm:$0xff] %v710_v25  ;;  %v695_v27 = vmul.f32 %v1433_v63, %v637_v26 }
 0x166   : > { %v587_v28 = vpop.f32.mrf.mxu2 }
 0x167   : > { %727 = vst [vmem:[%s1437_s10 + $0x78] sm:$0xff] %v695_v27  ;;  %v588_v29 = vadd.f32 %v1429_v59, %v587_v28  ;;  %v676_v30 = vpop.f32.mrf.mxu3 }
 0x169   : > { %v677_v31 = vadd.f32 %v676_v30, %v588_v29  ;;  %751 = sbr.rel (!%p1278_p11) target bundleno = 397 (0x18d), region = 48 }
 0x16b   : > { %v711_v32 = vmul.f32 %v1433_v63, %v677_v31 }
 0x16d   : > { %743 = vst [vmem:[%s1437_s10 + $0xf8] sm:$0xff] %v711_v32 }
 0x16e   : > { %s1617_s8 = smov (!%p754_p6, %s753_s8), 32 }
 0x16f   : > { %s933_s9 = sshll.u32 %s1617_s8, 3 }
 0x170   : > { %s757_s21 = ssub.s32 256, %s933_s9 }
 0x171   : > { %s758_s23 = sshll.u32 %s757_s21, 4 }
 0x172   : > { %759 = vsyncadd %s745_s11, %s758_s23  ;;  %p1541_p13 = scmp.ne.s32.totalorder %s933_s9, 0  ;;  %s959_s13 = sshll.u32 %s1247_s0, 8 }
 0x173   : > { %s762_s6 = scalar_lea.hbm %s1598_s4, %s959_s13  ;;  %s764_s7 = sshll.u32 %s1437_s10, 4  ;;  %s1550_s7 = int_to_ptr.vmem [resolvable:$true] %s764_s7 }
 0x174   : > { %s766_s27 = sshll.u32 %s762_s6, 4  ;;  %s937_s30 = sshll.u32 %s1617_s8, 7  ;;  %s1552_s27 = int_to_ptr.hbm [resolvable:$true] %s766_s27 }
 0x175   : > { %s1106_s15 = sshra.s32 %s1550_s7, 4  ;;  %s1108_s24 = sshrl.u32 %s937_s30, 4  ;;  %s1107_s15 = int_to_ptr.vmem [resolvable:$true] %s1106_s15 }
 0x176   : > { %s1113_s26 = scalar_lea.vmem %s1107_s15, %s1108_s24  ;;  %s1195_s0 = smov [#allocation8]  }
 0x177   : > { %p1114_p11 = scmp.ne.s32.totalorder %s1107_s15, %s1113_s26  ;;  %s1117_s12 = scalar_lea.vmem %s1195_s0, 512 }
 0x178   : > { %p1119_p10 = scmp.lt.s32.totalorder %s1117_s12, %s1113_s26 }
 0x179   : > { %p1115_p5 = pnand %p1114_p11, %p1541_p13 }
 0x17b   : > { %p1116_p9 = pneg %p1115_p5 }
 0x17d   : > { %p1121_p1 = pnand %p1119_p10, %p1116_p9 }
 0x17f   : > { %1124 = shalt.err (!%p1121_p1)
}
 0x180   : > { %s1125_s10 = sshra.s32 %s1552_s27, 4  ;;  %s1136_s13 = scalar_lea.hbm %s1598_s4, 600  ;;  %s1126_s10 = int_to_ptr.hbm [resolvable:$true] %s1125_s10 }
 0x181   : > { %s1132_s9 = scalar_lea.hbm %s1126_s10, %s1108_s24  ;;  %p1137_p7 = scmp.lt.s32.totalorder %s1126_s10, %s1598_s4 }
 0x182   : > { %p1133_p0 = scmp.ne.s32.totalorder %s1126_s10, %s1132_s9  ;;  %p1138_p8 = scmp.lt.s32.totalorder %s1136_s13, %s1132_s9 }
 0x184   : > { %p1134_p2 = pnand %p1133_p0, %p1541_p13  ;;  %p1139_p4 = por %p1138_p8, %p1137_p7 }
 0x186   : > { %p1135_p3 = pneg %p1134_p2 }
 0x188   : > { %p1140_p12 = pnand %p1139_p4, %p1135_p3 }
 0x18a   : > { %1143 = shalt.err (!%p1140_p12)
}
 0x18b   : > { %s1196_s6 = smov 128   ;;  %s1197_s15 = smov 8  }
 0x18c   : > { %772 = dma.vmem_to_hbm [thread:$0]  (%p1541_p13), %s1550_s7, %s937_s30, %s1552_s27, %s745_s11, %s1196_s6, %s1196_s6, %s1197_s15  }
 0x18d PF: > { %p994_p6 = scmp.ge.s32.totalorder %s1187_s20, 2  ;;  %s781_s24 = sand.u32 1, %s1175_s17  }
 0x18e   : > { %p1609_p11 = scmp.ne.s32.totalorder %s1603_s29, 0  ;;  %s782_s26 = scalar_lea.sflag [#allocation5], %s781_s24 }
 0x190   : > { %p989_p5 = pnand %p994_p6, %p1609_p11 }
 0x192   : > { %p990_p9 = pneg %p989_p5 }
 0x194   : > { %1170 = dma.done.wait (%p990_p9), %s782_s26, 4096  }
 0x195   : > { %1172 = vsyncadd (%p990_p9), %s782_s26, 4294963200  ;;  %p19_p10 = scmp.ge.s32.totalorder %s1251_s22, 5   ;;  %s1610_s17 = smov %s1179_s18 }
 0x196   : > { %s1611_s18 = smov %s1183_s19  ;;  %s1612_s19 = smov %s1263_s25 }
 0x197   : > { %s1613_s20 = smov %s1251_s22  ;;  %21 = sbr.rel (!%p19_p10) target bundleno = 8 (0x8), region = 85 }
 0x19c   :  { %788 = vsyncpa [#allocation4], 1 }
 0x19d   :  { %790 = vsyncpa [#allocation4 + $0x1], 1 }
 0x19e   :  { %791 = vsyncpa [#allocation7], 1 }
 0x19f   :  { %792 = vsyncpa [#allocation5], 1 }
 0x1a0   :  { %794 = vsyncpa [#allocation5 + $0x1], 1 }

</bundles_post_ra>
